<compile_context>
chip_gen: v5e
topology: v5e:2x2
jax: 0.10.0
libtpu: 0.0.40
codegen_flags: <defaults>
</compile_context>

<pallas_src>
import jax
import jax.numpy as jnp
from jax.experimental import pallas as pl
from jax.experimental.pallas import tpu as pltpu


# ---------------------------------------------------------------------------
# Zero-copy path: output aliases input, body is a dependency-only no-op.
# ---------------------------------------------------------------------------
def _touch_kernel(x_ref, o_ref):
    # No data movement: the output buffer *is* the input buffer (aliased).
    # Touch only pins the ordering dependency on the aliased output.
    del x_ref
    pltpu.touch(o_ref)


def _unflatten_zero_copy(x):
    N, F = x.shape
    return pl.pallas_call(
        _touch_kernel,
        out_shape=jax.ShapeDtypeStruct((N, F), x.dtype),
        in_specs=[pl.BlockSpec(memory_space=pl.ANY)],
        out_specs=pl.BlockSpec(memory_space=pl.ANY),
        input_output_aliases={0: 0},  # donate x: no copy, no new allocation
        cost_estimate=pl.CostEstimate(
            flops=0, transcendentals=0, bytes_accessed=0
        ),
    )(x)


# ---------------------------------------------------------------------------
# Materializing fallback: lane-dense tiled identity copy (non-donating).
# ---------------------------------------------------------------------------
def _copy_kernel(x_ref, o_ref):
    # One vld + one vst per vreg; pure HBM-roofline copy.
    o_ref[...] = x_ref[...]


def _pick_block_bytes_and_vmem_limit():
    """Per-generation block sizing: ~8 MiB on v7x (64 MiB VMEM) with a raised
    scoped-VMEM limit, ~4 MiB on v5e/v6e (128 MiB physical VMEM)."""
    try:
        vmem = pltpu.get_tpu_info().vmem_capacity_bytes
        if vmem <= 80 * 1024 * 1024:  # v7x-class: 64 MiB VMEM per TC
            return 8 * 1024 * 1024, 48 * 1024 * 1024
        return 4 * 1024 * 1024, 32 * 1024 * 1024  # v5e / v6e
    except Exception:
        return 2 * 1024 * 1024, None  # conservative default


def _unflatten_copy(x):
    N, F = x.shape
    itemsize = jnp.dtype(x.dtype).itemsize
    total = N * F
    block_bytes, vmem_limit = _pick_block_bytes_and_vmem_limit()
    traffic = 2 * total * itemsize

    if total % 128 == 0:
        # Lane-dense flat tiling: (rows, L) with L an exact multiple of 128.
        L = 128
        for cand in range(8192, 127, -128):
            if total % cand == 0:
                L = cand
                break
        rows = total // L
        row_bytes = L * itemsize
        tile_rows = max(8, (block_bytes // max(1, row_bytes)) // 8 * 8)
        if rows >= 16:
            # Keep >= 2 grid steps: both v7x TCs get work + pipeline overlap.
            tile_rows = min(tile_rows, max(8, (rows // 2) // 8 * 8))
        if tile_rows >= rows:
            tile_rows = rows  # full extent along rows — always legal
        grid = (pl.cdiv(rows, tile_rows),)

        flat = pl.pallas_call(
            _copy_kernel,
            out_shape=jax.ShapeDtypeStruct((rows, L), x.dtype),
            grid=grid,
            in_specs=[pl.BlockSpec((tile_rows, L), lambda i: (i, 0))],
            out_specs=pl.BlockSpec((tile_rows, L), lambda i: (i, 0)),
            compiler_params=pltpu.CompilerParams(
                dimension_semantics=("parallel",),
                vmem_limit_bytes=vmem_limit,
            ),
            cost_estimate=pl.CostEstimate(
                flops=0, transcendentals=0, bytes_accessed=traffic
            ),
        )(x.reshape(rows, L))
        return flat.reshape(N, F)

    # Row tiling fallback (F not 128-divisible): full-extent F as last dim.
    mult = max(8, 32 // itemsize)  # sublane packing multiple per dtype
    tile_n = max(mult, (block_bytes // max(1, F * itemsize)) // mult * mult)
    if tile_n >= N:
        tile_n = N
    grid = (pl.cdiv(N, tile_n),)

    return pl.pallas_call(
        _copy_kernel,
        out_shape=jax.ShapeDtypeStruct((N, F), x.dtype),
        grid=grid,
        in_specs=[pl.BlockSpec((tile_n, F), lambda i: (i, 0))],
        out_specs=pl.BlockSpec((tile_n, F), lambda i: (i, 0)),
        compiler_params=pltpu.CompilerParams(
            dimension_semantics=("parallel",),
            vmem_limit_bytes=vmem_limit,
        ),
        cost_estimate=pl.CostEstimate(
            flops=0, transcendentals=0, bytes_accessed=traffic
        ),
    )(x)


# ---------------------------------------------------------------------------
# Public wrapper: Pallas equivalent of Unflatten.forward.
# ---------------------------------------------------------------------------
def unflatten(x, C, H, W, *, donate=True):
    """(N, C*H*W) -> (N, C, H, W).

    donate=True  : zero-copy path; x's HBM buffer is reused (donated) — the
                   caller must NOT read x after this call.
    donate=False : materializing lane-dense copy; x stays valid.
    """
    N, F = x.shape
    assert F == C * H * W, f"expected last dim {C * H * W}, got {F}"

    if donate:
        try:
            flat = _unflatten_zero_copy(x)
        except Exception:
            # If the no-op/ANY-alias variant cannot lower on this backend,
            # fall back to the materializing copy (x not yet donated here).
            flat = _unflatten_copy(x)
    else:
        flat = _unflatten_copy(x)

    # Metadata-only reshape (same semantics as torch.Tensor.view); kept
    # outside the kernel so the kernel output stays 2-D and lane-dense.
    return flat.reshape(N, C, H, W)


if __name__ == "__main__":
    # Module defaults are C=128, H=7, W=7; use small deterministic shapes.
    N, C, H, W = 2, 4, 7, 7
    key = jax.random.PRNGKey(0)
    x = jax.random.normal(key, (N, C * H * W), dtype=jnp.float32)

    # Reference materialized BEFORE the donating call.
    ref = jax.block_until_ready(jnp.reshape(x, (N, C, H, W)))

    # 1) Primary zero-copy path (donates x — x is not read again below).
    out = unflatten(x, C, H, W, donate=True)
    out = jax.block_until_ready(out)
    assert out.shape == (N, C, H, W)
    assert out.dtype == jnp.float32
    assert jnp.array_equal(out, ref)

    # 2) Materializing copy path, lane-dense flat tiling (N*F % 128 == 0).
    N2, C2, H2, W2 = 2, 4, 8, 8
    x2 = jax.random.normal(jax.random.PRNGKey(1), (N2, C2 * H2 * W2), jnp.float32)
    ref2 = x2.reshape(N2, C2, H2, W2)
    out2 = jax.block_until_ready(unflatten(x2, C2, H2, W2, donate=False))
    assert jnp.array_equal(out2, ref2)
    assert jnp.array_equal(x2, x2.reshape(N2, -1).reshape(x2.shape))  # x2 still valid

    # 3) Materializing copy path, row-tiling fallback (F = 196, not 128-div).
    x3 = jax.random.normal(jax.random.PRNGKey(2), (N, C * H * W), jnp.float32)
    ref3 = x3.reshape(N, C, H, W)
    out3 = jax.block_until_ready(unflatten(x3, C, H, W, donate=False))
    assert jnp.array_equal(out3, ref3)

    print("KERNEL_OK")
</pallas_src>

<mosaic_0001>
module attributes {stable_mosaic.version = 11 : i64} {
  func.func @_touch_kernel(%arg0: memref<2x196xf32, #tpu.memory_space<any>>, %arg1: memref<2x196xf32, #tpu.memory_space<any>>) attributes {dimension_semantics = [], scalar_prefetch = 0 : i64, scratch_operands = 0 : i64, tpu.core_type = #tpu.core_type<tc>} {
    return
  }
}

module attributes {stable_mosaic.version = 11 : i64} {
  func.func @_copy_kernel(%arg0: i32, %arg1: memref<2x196xf32, #tpu.memory_space<vmem>>, %arg2: memref<2x196xf32, #tpu.memory_space<vmem>>) attributes {dimension_semantics = [#tpu.dimension_semantics<parallel>], iteration_bounds = array<i64: 1>, scalar_prefetch = 0 : i64, scratch_operands = 0 : i64, tpu.core_type = #tpu.core_type<tc>, window_params = [{transform_indices = @transform_0, window_bounds = array<i64: 2, 196>}, {transform_indices = @transform_1, window_bounds = array<i64: 2, 196>}]} {
    %c0 = arith.constant 0 : index
    %c0_0 = arith.constant 0 : index
    %0 = vector.load %arg1[%c0, %c0_0] : memref<2x196xf32, #tpu.memory_space<vmem>>, vector<2x196xf32>
    %c0_1 = arith.constant 0 : index
    %c0_2 = arith.constant 0 : index
    %1 = vector.load %arg2[%c0_1, %c0_2] : memref<2x196xf32, #tpu.memory_space<vmem>>, vector<2x196xf32>
    tpu.vector_store %arg2[%c0_1, %c0_2], %0 {strides = array<i32>} : memref<2x196xf32, #tpu.memory_space<vmem>>, vector<2x196xf32>,
    return
  }
  func.func @transform_0(%arg0: i32) -> (i32, i32) {
    %c0_i32 = arith.constant 0 : i32
    %c0_i32_0 = arith.constant 0 : i32
    return %arg0, %c0_i32 : i32, i32
  }
  func.func @transform_1(%arg0: i32) -> (i32, i32) {
    %c0_i32 = arith.constant 0 : i32
    %c0_i32_0 = arith.constant 0 : i32
    return %arg0, %c0_i32 : i32, i32
  }
}

</mosaic_0001>

<bundles_post_ra>
// kernel: tpu_custom_call.1
= control target key start
LH: loop header
LB: loop body
LE: loop exit
PB: predicated region body
PF: predicated region fallthrough
CT: control target
= control target key end

     0   :  { %s16_s0 = inlined_call_operand.hbm [shape: f32[2,196], index: 0, kind: input, shape index: {}, may-alias: {0,1}]   ;;  %s17_s1 = inlined_call_operand.hbm [shape: f32[2,196], index: 1, kind: output, shape index: {}, may-alias: {0,1}]  }

// kernel: tpu_custom_call.1
= control target key start
LH: loop header
LB: loop body
LE: loop exit
PB: predicated region body
PF: predicated region fallthrough
CT: control target
= control target key end

     0   :  { %6 = vsyncpa [#allocation3], 0  ;;  %s117_s0 = inlined_call_operand.hbm [shape: f32[2,196], index: 0, kind: input, shape index: {}]   ;;  %s118_s1 = inlined_call_operand.hbm [shape: f32[2,196], index: 1, kind: output, shape index: {}]  }
   0x1   :  { %7 = vsyncpa [#allocation4], 0  ;;  %s13_s8 = sshll.u32 %s117_s0, 4  ;;  %s99_s9 = smov [#allocation2]   ;;  %s14_s8 = int_to_ptr.hbm [resolvable:$true] %s13_s8 }
   0x2   :  { %s15_s10 = sshll.u32 %s99_s9, 4  ;;  %s16_s10 = int_to_ptr.vmem [resolvable:$true] %s15_s10 }
   0x3   :  { %18 = dma.hbm_to_vmem [thread:$0]  %s14_s8, 64, %s16_s10, [#allocation3]  }
   0x4   :  { %95 = dma.done.wait [#allocation3], 64  }
   0x5   :  { %96 = vsyncadd [#allocation3], 4294967232  ;;  %vm24_vm0 = vcmask 1041408   ;;  %vm25_vm1 = vcmask 551938   ;;  %s100_s11 = smov [#allocation5]   ;;  %s35_s15 = sshll.u32 %s118_s1, 4  ;;  %s36_s15 = int_to_ptr.hbm [resolvable:$true] %s35_s15 }
   0x6   :  { %s33_s12 = sshll.u32 %s100_s11, 4  ;;  %vm26_vm2 = vmor %vm25_vm1, %vm24_vm0  ;;  %v23_v0 = vld [vmem:[#allocation2] sm:$0xf]  ;;  %s34_s12 = int_to_ptr.vmem [resolvable:$true] %s33_s12 }
   0x7   :  { %27 = vst.msk [vmem:[#allocation5] sm:$0xf] %vm26_vm2, %v23_v0 }
   0x8   :  { %38 = dma.vmem_to_hbm [thread:$0]  %s34_s12, 64, %s36_s15, [#allocation4]  }
   0x9   :  { %97 = dma.done.wait [#allocation4], 64  }
   0xa   :  { %98 = vsyncadd [#allocation4], 4294967232 }
   0xb   :  { %43 = vsyncpa [#allocation3], 1 }
   0xc   :  { %44 = vsyncpa [#allocation4], 1 }

</bundles_post_ra>
